<compile_context>
chip_gen: v7x
topology: tpu7x:2x2x1
jax: 0.10.0
libtpu: 0.0.40
codegen_flags: <defaults>
</compile_context>

<pallas_src>
import numpy as np
import jax
import jax.numpy as jnp
from jax.experimental import pallas as pl
from jax.experimental.pallas import tpu as pltpu


# ---------------------------------------------------------------------------
# Per-ROI separable RoIAlign interpolation weights (plain-JAX glue, tiny).
# Matches torchvision.ops.RoIAlign with spatial_scale=1, sampling_ratio=1,
# aligned=False (legacy): one sample at each bin centre, roi size clamped to
# >= 1, zero outside [-1, in_size], clamp at the last pixel.
# ---------------------------------------------------------------------------
def _roi_axis_weights(c_start, c_end, in_size, out_size):
    c_start = c_start.astype(jnp.float32)
    c_end = c_end.astype(jnp.float32)
    roi_len = jnp.maximum(c_end - c_start, 1.0)              # aligned=False clamp
    bin_sz = roi_len / float(out_size)
    p = jnp.arange(out_size, dtype=jnp.float32)
    coord = c_start[:, None] + (p[None, :] + 0.5) * bin_sz[:, None]    # (A, S)
    valid = (coord >= -1.0) & (coord <= float(in_size))
    cc = jnp.maximum(coord, 0.0)
    low_f = jnp.floor(cc)
    at_edge = low_f >= float(in_size - 1)
    low = jnp.where(at_edge, in_size - 1, low_f).astype(jnp.int32)
    high = jnp.where(at_edge, in_size - 1, low_f + 1.0).astype(jnp.int32)
    frac = jnp.where(at_edge, 0.0, cc - low_f)
    grid = jnp.arange(in_size, dtype=jnp.int32)
    w = ((1.0 - frac)[..., None] * (low[..., None] == grid).astype(jnp.float32)
         + frac[..., None] * (high[..., None] == grid).astype(jnp.float32))
    return w * valid[..., None].astype(jnp.float32)          # (A, S, in_size)


# ---------------------------------------------------------------------------
# Pallas kernel: one ROI per grid step, all channels at once, one MXU GEMM.
#   feat_ref : (C, H*W)      -- block selected by the scalar-prefetched bidx
#   wkt_ref  : (H*W, S*S)    -- per-ROI combined (kron) interpolation weights
#   out_ref  : (C, S*S)      -- lane-dense output block
# ---------------------------------------------------------------------------
def _roi_align_kernel(bidx_ref, feat_ref, wkt_ref, out_ref):
    del bidx_ref  # consumed by the index_maps (scalar prefetch), not the body
    out_ref[...] = jnp.dot(
        feat_ref[...], wkt_ref[...], preferred_element_type=jnp.float32
    ).astype(out_ref.dtype)


def roi_align_pallas(feat, boxes, batch_index, out_size):
    """RoIAlign(spatial_scale=1, sampling_ratio=1, aligned=False) on NCHW feat.

    feat: (N, C, H, W); boxes: (A, 4) xyxy in feature coords; batch_index: (A,).
    Returns (A, C, out_size, out_size) in feat.dtype.
    """
    N, C, H, W = feat.shape
    A = boxes.shape[0]
    S = int(out_size)
    HW, S2 = H * W, S * S

    # Separable per-ROI weights, combined so the kernel is one lane-dense GEMM.
    wy = _roi_axis_weights(boxes[:, 1], boxes[:, 3], H, S)    # (A, S, H)
    wx = _roi_axis_weights(boxes[:, 0], boxes[:, 2], W, S)    # (A, S, W)
    # wkt[a, h*W + w, p*S + q] = wy[a, p, h] * wx[a, q, w]
    wkt = jnp.einsum("aph,aqw->ahwpq", wy, wx).reshape(A, HW, S2)

    # bf16 MXU operands (f32 accumulation) when the features are bf16.
    compute_dtype = jnp.bfloat16 if feat.dtype == jnp.bfloat16 else jnp.float32
    wkt = wkt.astype(compute_dtype)
    feat_flat = feat.reshape(N, C, HW)            # free reshape, no relayout

    itemsize = jnp.dtype(feat.dtype).itemsize
    cost = pl.CostEstimate(
        flops=int(2 * A * C * HW * S2),
        transcendentals=0,
        bytes_accessed=int(itemsize * A * (C * HW + HW * S2 + C * S2)),
    )

    out = pl.pallas_call(
        _roi_align_kernel,
        out_shape=jax.ShapeDtypeStruct((A, C, S2), feat.dtype),
        grid_spec=pltpu.PrefetchScalarGridSpec(
            num_scalar_prefetch=1,                # batch_index -> SMEM
            grid=(A,),                            # one ROI (all channels) / step
            in_specs=[
                # Batch-index gather fused into the feature index_map: no
                # feat[batch_index] / crop materialization in HBM.
                pl.BlockSpec((pl.Squeezed(), C, HW),
                             lambda a, bidx: (bidx[a], 0, 0)),
                pl.BlockSpec((pl.Squeezed(), HW, S2),
                             lambda a, bidx: (a, 0, 0)),
            ],
            out_specs=pl.BlockSpec((pl.Squeezed(), C, S2),
                                   lambda a, bidx: (a, 0, 0)),
        ),
        compiler_params=pltpu.CompilerParams(
            dimension_semantics=("parallel",),
        ),
        cost_estimate=cost,
    )(batch_index.astype(jnp.int32), feat_flat, wkt)

    return out.reshape(A, C, S, S)


# ---------------------------------------------------------------------------
# Module-equivalent wrapper (mirrors CropperQAT.forward / generate_roi).
# ---------------------------------------------------------------------------
class CropperQATPallas:
    """JAX/Pallas equivalent of CropperQAT: per-scale RoIAlign + channel concat.

    Output: (agent_num, sum(C_i), size, size).
    """

    ROI_QUANT_SCALE = 0.25   # QuantStub(scale=0.25) qint16 fake-quant of ROIs

    def __init__(self, size, strides):
        self.size = int(size)
        self.strides = list(strides)

    def _quant_roi(self, x):
        # TODO(synk): full qint16 FakeQuantize/observer state is training-time
        # machinery; forward behaviour is round-to-multiple-of-scale.
        s = self.ROI_QUANT_SCALE
        return jnp.round(x / s) * s

    def generate_roi(self, pixel, batch_index):
        pixel = jnp.asarray(pixel, dtype=jnp.float32)
        bcol = jnp.asarray(batch_index, dtype=jnp.float32)[:, None]
        half = self.size / 2.0
        rois = []
        for s in self.strides:
            tl = jnp.maximum(pixel / s - half, 0.0)
            br = jnp.maximum(pixel / s + half, 0.0)
            roi = jnp.concatenate([bcol, tl, br], axis=-1)     # (A, 5)
            rois.append(self._quant_roi(roi))
        return rois

    @staticmethod
    def _as_batched_rois(r):
        # Accept either an (A, 5) array [b, x1, y1, x2, y2] or a per-image
        # list of (A_i, 4) boxes (torchvision RoIAlign list format).
        if isinstance(r, (list, tuple)):
            parts = []
            for b, rb in enumerate(r):
                rb = jnp.asarray(rb, dtype=jnp.float32)
                bcol = jnp.full((rb.shape[0], 1), float(b), dtype=jnp.float32)
                parts.append(jnp.concatenate([bcol, rb], axis=-1))
            return jnp.concatenate(parts, axis=0)
        return jnp.asarray(r, dtype=jnp.float32)

    def __call__(self, feature_maps, pixel=None, batch_index=None, rois=None):
        if rois is not None:
            rois = [self._quant_roi(self._as_batched_rois(r)) for r in rois]
        else:
            rois = self.generate_roi(pixel, batch_index)
        parts = []
        for f, roi in zip(feature_maps, rois):
            bidx = roi[:, 0].astype(jnp.int32)
            boxes = roi[:, 1:5]
            parts.append(roi_align_pallas(f, boxes, bidx, self.size))
        return jnp.concatenate(parts, axis=1)


# ---------------------------------------------------------------------------
# Independent numpy RoIAlign reference (direct loop port of torchvision fwd,
# spatial_scale=1, sampling_ratio=1, aligned=False).
# ---------------------------------------------------------------------------
def _roi_align_ref_np(feat, boxes, batch_index, out_size):
    feat = np.asarray(feat, dtype=np.float64)
    boxes = np.asarray(boxes, dtype=np.float64)
    n, c, h, w = feat.shape
    a_num = boxes.shape[0]
    out = np.zeros((a_num, c, out_size, out_size), dtype=np.float64)
    for a in range(a_num):
        x_start, y_start, x_end, y_end = boxes[a]
        b = int(batch_index[a])
        roi_w = max(x_end - x_start, 1.0)
        roi_h = max(y_end - y_start, 1.0)
        bin_w = roi_w / out_size
        bin_h = roi_h / out_size
        for ph in range(out_size):
            y = y_start + (ph + 0.5) * bin_h
            if y < -1.0 or y > h:
                continue
            yc = max(y, 0.0)
            yl = int(np.floor(yc))
            if yl >= h - 1:
                yl = yh = h - 1
                ly = 0.0
            else:
                yh = yl + 1
                ly = yc - yl
            for pw in range(out_size):
                x = x_start + (pw + 0.5) * bin_w
                if x < -1.0 or x > w:
                    continue
                xc = max(x, 0.0)
                xl = int(np.floor(xc))
                if xl >= w - 1:
                    xl = xh = w - 1
                    lx = 0.0
                else:
                    xh = xl + 1
                    lx = xc - xl
                hy, hx = 1.0 - ly, 1.0 - lx
                out[a, :, ph, pw] = (
                    hy * hx * feat[b, :, yl, xl] + hy * lx * feat[b, :, yl, xh]
                    + ly * hx * feat[b, :, yh, xl] + ly * lx * feat[b, :, yh, xh]
                )
    return out


# ---------------------------------------------------------------------------
# Demo / smoke test
# ---------------------------------------------------------------------------
if __name__ == "__main__":
    key = jax.random.PRNGKey(0)
    k_f4, k_f8, k_pix = jax.random.split(key, 3)

    N, A, size = 2, 6, 16
    strides = [4, 8]
    feat_s4 = jax.random.normal(k_f4, (N, 4, 32, 32), dtype=jnp.float32)
    feat_s8 = jax.random.normal(k_f8, (N, 4, 16, 16), dtype=jnp.float32)
    feature_maps = [feat_s4, feat_s8]

    # Agent pixels on the original raster map + per-agent batch index.
    pixel = jax.random.uniform(k_pix, (A, 2), dtype=jnp.float32,
                               minval=10.0, maxval=118.0)
    batch_index = jnp.array([0, 1, 0, 1, 1, 0], dtype=jnp.int32)

    cropper = CropperQATPallas(size=size, strides=strides)
    out = jax.block_until_ready(
        cropper(feature_maps, pixel=pixel, batch_index=batch_index))
    assert out.shape == (A, 8, size, size), out.shape

    # Reference: same (quantized) rois, independent loop-based RoIAlign.
    rois = cropper.generate_roi(pixel, batch_index)
    ref_parts = []
    for f, roi in zip(feature_maps, rois):
        roi_np = np.asarray(roi, dtype=np.float64)
        ref_parts.append(
            _roi_align_ref_np(np.asarray(f), roi_np[:, 1:5],
                              roi_np[:, 0].astype(np.int64), size))
    ref = np.concatenate(ref_parts, axis=1)
    np.testing.assert_allclose(np.asarray(out), ref, rtol=1e-4, atol=1e-4)

    print("KERNEL_OK")
</pallas_src>

<mosaic_0001>
module attributes {stable_mosaic.version = 11 : i64} {
  func.func @_roi_align_kernel(%arg0: i32, %arg1: memref<6xi32, #tpu.memory_space<smem>>, %arg2: memref<1x4x1024xf32, #tpu.memory_space<vmem>>, %arg3: memref<1x1024x256xf32, #tpu.memory_space<vmem>>, %arg4: memref<1x4x256xf32, #tpu.memory_space<vmem>>) attributes {dimension_semantics = [#tpu.dimension_semantics<parallel>], iteration_bounds = array<i64: 6>, scalar_prefetch = 1 : i64, scratch_operands = 0 : i64, tpu.core_type = #tpu.core_type<tc>, window_params = [{transform_indices = @transform_0, window_bounds = array<i64: 1, 4, 1024>}, {transform_indices = @transform_1, window_bounds = array<i64: 1, 1024, 256>}, {transform_indices = @transform_2, window_bounds = array<i64: 1, 4, 256>}]} {
    %c0 = arith.constant 0 : index
    %c0_0 = arith.constant 0 : index
    %c0_1 = arith.constant 0 : index
    %0 = vector.load %arg2[%c0, %c0_0, %c0_1] : memref<1x4x1024xf32, #tpu.memory_space<vmem>>, vector<1x4x1024xf32>
    %1 = vector.shape_cast %0 : vector<1x4x1024xf32> to vector<4x1024xf32>
    %c0_2 = arith.constant 0 : index
    %c0_3 = arith.constant 0 : index
    %c0_4 = arith.constant 0 : index
    %2 = vector.load %arg3[%c0_2, %c0_3, %c0_4] : memref<1x1024x256xf32, #tpu.memory_space<vmem>>, vector<1x1024x256xf32>
    %3 = vector.shape_cast %2 : vector<1x1024x256xf32> to vector<1024x256xf32>
    %cst = arith.constant dense<0.000000e+00> : vector<4x256xf32>
    %4 = tpu.matmul %1, %3, %cst {dimension_numbers = #tpu.dot_dimension_numbers<[1], [0], [0], [1], [0, 0, 1, 1], [], []>} : vector<4x1024xf32>, vector<1024x256xf32>, vector<4x256xf32> -> vector<4x256xf32>
    %c0_5 = arith.constant 0 : index
    %c0_6 = arith.constant 0 : index
    %c0_7 = arith.constant 0 : index
    %5 = vector.load %arg4[%c0_5, %c0_6, %c0_7] : memref<1x4x256xf32, #tpu.memory_space<vmem>>, vector<1x4x256xf32>
    %6 = vector.shape_cast %5 : vector<1x4x256xf32> to vector<4x256xf32>
    %7 = vector.shape_cast %4 : vector<4x256xf32> to vector<1x4x256xf32>
    tpu.vector_store %arg4[%c0_5, %c0_6, %c0_7], %7 {strides = array<i32>} : memref<1x4x256xf32, #tpu.memory_space<vmem>>, vector<1x4x256xf32>,
    return
  }
  func.func @transform_0(%arg0: i32, %arg1: memref<6xi32, #tpu.memory_space<smem>>) -> (i32, i32, i32) {
    %0 = arith.index_cast %arg0 : i32 to index
    %1 = memref.load %arg1[%0] : memref<6xi32, #tpu.memory_space<smem>>
    %c0_i32 = arith.constant 0 : i32
    %c0_i32_0 = arith.constant 0 : i32
    %c0_i32_1 = arith.constant 0 : i32
    return %1, %c0_i32, %c0_i32_0 : i32, i32, i32
  }
  func.func @transform_1(%arg0: i32, %arg1: memref<6xi32, #tpu.memory_space<smem>>) -> (i32, i32, i32) {
    %c0_i32 = arith.constant 0 : i32
    %c0_i32_0 = arith.constant 0 : i32
    %c0_i32_1 = arith.constant 0 : i32
    return %arg0, %c0_i32, %c0_i32_0 : i32, i32, i32
  }
  func.func @transform_2(%arg0: i32, %arg1: memref<6xi32, #tpu.memory_space<smem>>) -> (i32, i32, i32) {
    %c0_i32 = arith.constant 0 : i32
    %c0_i32_0 = arith.constant 0 : i32
    %c0_i32_1 = arith.constant 0 : i32
    return %arg0, %c0_i32, %c0_i32_0 : i32, i32, i32
  }
}

</mosaic_0001>

<bundles_post_ra>
// kernel: tpu_custom_call.1
= control target key start
LH: loop header
LB: loop body
LE: loop exit
PB: predicated region body
PF: predicated region fallthrough
CT: control target
= control target key end

     0   :  { %s2002_s0 = inlined_call_operand.hbm [shape: s32[6], index: 0, kind: input, shape index: {}]   ;;  %s2003_s1 = inlined_call_operand.hbm [shape: f32[2,4,1024], index: 1, kind: input, shape index: {}]   ;;  %s2004_s2 = inlined_call_operand.hbm [shape: f32[6,1024,256], index: 2, kind: input, shape index: {}]   ;;  %s2005_s3 = inlined_call_operand.hbm [shape: f32[6,4,256], index: 3, kind: output, shape index: {}]  }
   0x1   :  { %s1247_s14 = scalar_lea.hbm %s2002_s0, 16 }
   0x2   :  { %p1248_p0 = scmp.ne.s32.totalorder %s2002_s0, %s1247_s14  ;;  %p1251_p1 = scmp.lt.u32.totalorder %s1247_s14, %s2002_s0 }
   0x4   :  { %p1253_p2 = pnand %p1251_p1, %p1248_p0 }
   0x6   :  { %1256 = shalt.err (!%p1253_p2)  }
   0x7   :  { %s1415_s19 = smov [#allocation3]  }
   0x8   :  { %9 = dma.hbm_to_smem %s2002_s0, 16, %s1415_s19, [#allocation2] }
   0x9   :  { %1373 = dma.done.wait [#allocation2], 16 }
   0xa   :  { %1374 = vsyncadd [#allocation2], 4294967280 }
   0xb   :  { %11 = sfence }
   0xc   :  { %12 = vsyncpa [#allocation5], 0 }
   0xd   :  { %14 = vsyncpa [#allocation5 + $0x1], 0 }
   0xe   :  { %15 = vsyncpa [#allocation8], 0 }
   0xf   :  { %17 = vsyncpa [#allocation8 + $0x1], 0 }
  0x10   :  { %18 = vsyncpa [#allocation6], 0 }
  0x11   :  { %20 = vsyncpa [#allocation6 + $0x1], 0  ;;  %s1453_s22 = smov 0   ;;  %s1455_s23 = smov 0  }
  0x12   :  { %s1457_s24 = smov 0   ;;  %s1459_s25 = smov 0  }
  0x13   :  { %s1461_s26 = smov 0   ;;  %s1463_s0 = smov 0  }
  0x14   :  { %s1465_s27 = smov 0  }
  0x15 LB: > { %s1487_s28 = sadd.s32 4294967295, %s1413_s27   ;;  %s1490_s29 = sadd.s32 1, %s1413_s27   ;;  %s1413_s27 = sphi %s1465_s27, %s2033_s27   ;;  %s1409_s0 = sphi %s1463_s0, %s2032_s0   ;;  %s1405_s26 = sphi %s1461_s26, %s2031_s26   ;;  %s1401_s25 = sphi %s1459_s25, %s2030_s25   ;;  %s1397_s24 = sphi %s1457_s24, %s2029_s24   ;;  %s1393_s23 = sphi %s1455_s23, %s2028_s23   ;;  %s1389_s22 = sphi %s1453_s22, %s2027_s22  }
  0x16   : > { %s30_s30 = sld [smem:[#allocation3 + %s1413_s27]]  ;;  %s35_s5 = sadd.s32 1, %s1409_s0 }
  0x17   : > { %s31_s4 = sld [smem:[#allocation3 + %s1490_s29]]  ;;  %p42_p3 = scmp.ne.s32.totalorder %s1409_s0, %s1405_s26 }
  0x18   : > { %p2008_p4 = scmp.eq.s32.totalorder %s1413_s27, 0  ;;  %p48_p5 = scmp.ne.s32.totalorder %s1405_s26, %s1401_s25 }
  0x19   : > { %p2007_p6 = scmp.eq.s32.totalorder %s1487_s28, 0  ;;  %p2006_p10 = scmp.lt.s32.totalorder %s1413_s27, 6 }
  0x1a   : > { %p44_p8 = por %p2008_p4, %p42_p3  ;;  %s124_s8 = sand.u32 1, %s1409_s0  }
  0x1b   : > { %p1505_p9 = por %p2007_p6, %p48_p5  ;;  %s881_s9 = sshll.u32 %s124_s8, 5 }
  0x1c   : > { %p1513_p12 = pnand %p2006_p10, %p44_p8  ;;  %s128_s14 = scalar_lea.vmem [#allocation4], %s881_s9 }
  0x1d   : > { %s2011_s6 = scalar_select %p1505_p9, 1, 0 }
  0x1e   : > { %s32_s7 = ssub.s32 %s30_s30, %s31_s4  ;;  %s137_s15 = sshll.u32 %s128_s14, 4  ;;  %s1526_s15 = int_to_ptr.vmem [resolvable:$true] %s137_s15 }
  0x1f   : > { %p33_p11 = scmp.eq.s32.totalorder %s32_s7, 0  ;;  %p887_p13 = scmp.ge.s32.totalorder %s1413_s27, 1 }
  0x20   : > { %s1161_s12 = scalar_select %p44_p8, [#allocation3], [#allocation10] }
  0x21   : > { %s1518_s11 = scalar_select %p33_p11, %s1409_s0, %s35_s5  }
  0x22   : > { %s1162_s13 = scalar_select %p44_p8, %s1413_s27, 0 }
  0x23   : > { %s2035_s12 = smov (!%p2006_p10, %s1161_s12), [#allocation11]  ;;  %p163_p0 = scmp.lt.s32.totalorder %s1413_s27, 7 }
  0x24   : > { %s2037_s13 = smov (!%p2006_p10, %s1162_s13), 0  ;;  %s878_s18 = sadd.s32 4294967294, %s1413_s27  }
  0x25   : > { %s129_s16 = sld [smem:[%s2035_s12 + %s2037_s13]]  ;;  %p1529_p1 = pnand %p887_p13, %p163_p0 }
  0x26   : > { %s58_s19 = ssub.s32 %s1413_s27, %s1490_s29  ;;  %s61_s5 = sadd.s32 1, %s1397_s24 }
  0x27   : > { %s2013_s17 = scalar_select %p1529_p1, 1, 0 }
  0x28   : > { %p1536_p2 = scmp.eq.s32.totalorder %s58_s19, 0  ;;  %s125_s7 = scalar_lea.sflag [#allocation5], %s124_s8 }
  0x29   : > { %p1259_p5 = pneg %p1513_p12  ;;  %s1262_s14 = scalar_lea.hbm %s2003_s1, 1024 }
  0x2b   : > { %s896_s20 = sshll.u32 %s129_s16, 9 }
  0x2c   : > { %s1543_s4 = scalar_lea.hbm %s2003_s1, %s896_s20 }
  0x2d   : > { %s1257_s9 = scalar_lea.hbm %s1543_s4, 512  ;;  %p1263_p13 = scmp.lt.u32.totalorder %s1543_s4, %s2003_s1 }
  0x2e   : > { %p1258_p3 = scmp.ne.s32.totalorder %s1543_s4, %s1257_s9  ;;  %p1264_p0 = scmp.lt.u32.totalorder %s1262_s14, %s1257_s9 }
  0x2f   : > { %p1266_p7 = scmp.lt.u32.totalorder %s1257_s9, %s1543_s4 }
  0x30   : > { %p1260_p8 = pnand %p1259_p5, %p1258_p3  ;;  %p1265_p10 = por %p1264_p0, %p1263_p13 }
  0x32   : > { %p1261_p11 = pneg %p1260_p8  ;;  %p1267_p6 = por %p1266_p7, %p1265_p10 }
  0x34   : > { %p1268_p4 = pnand %p1267_p6, %p1261_p11 }
  0x36   : > { %1271 = shalt.err (!%p1268_p4)
}
  0x37   : > { %s1272_s8 = scalar_lea.vmem %s1526_s15, 512  ;;  %s1416_s20 = smov [#allocation4]  }
  0x38   : > { %p1273_p3 = scmp.ne.s32.totalorder %s1526_s15, %s1272_s8  ;;  %s1277_s25 = sshll.u32 %s1416_s20, 4  ;;  %s1278_s25 = int_to_ptr.vmem [resolvable:$false] %s1277_s25 }
  0x39   : > { %s1279_s30 = scalar_lea.vmem %s1278_s25, 1024  ;;  %p1280_p1 = scmp.lt.s32.totalorder %s1526_s15, %s1278_s25 }
  0x3a   : > { %p1275_p8 = pnand %p1273_p3, %p1259_p5  ;;  %p1281_p13 = scmp.lt.s32.totalorder %s1279_s30, %s1272_s8 }
  0x3c   : > { %p1276_p9 = pneg %p1275_p8  ;;  %p1282_p0 = por %p1281_p13, %p1280_p1 }
  0x3e   : > { %p1283_p7 = pnand %p1282_p0, %p1276_p9 }
  0x40   : > { %1286 = shalt.err (!%p1283_p7)
}
  0x41   : > { %1174 = dma.hbm_to_vmem [thread:$0]  (!%p1513_p12), %s1543_s4, 512, %s1526_s15, %s125_s7  }
  0x42   : > { %s1576_s10 = scalar_select %p1536_p2, %s1397_s24, %s61_s5  }
  0x43   : > { %p68_p4 = scmp.ne.s32.totalorder %s1397_s24, %s1393_s23  ;;  %p74_p6 = scmp.ne.s32.totalorder %s1393_s23, %s1389_s22 }
  0x44   : > { %p104_p9 = scmp.eq.s32.totalorder %s878_s18, 5  ;;  %s144_s9 = sand.u32 1, %s1397_s24  }
  0x45   : > { %p2015_p10 = scmp.eq.s32.totalorder %s1413_s27, 0  ;;  %p2016_p5 = scmp.eq.s32.totalorder %s1487_s28, 0 }
  0x46   : > { %p2018_p3 = scmp.eq.s32.totalorder %s1487_s28, 5  ;;  %p1599_p12 = por %p104_p9, %p74_p6 }
  0x47   : > { %p70_p1 = por %p68_p4, %p2015_p10  ;;  %p1589_p11 = por %p74_p6, %p2016_p5 }
  0x48   : > { %p1595_p8 = por %p2018_p3, %p68_p4  ;;  %s884_s4 = sshll.u32 %s144_s9, 11 }
  0x49   : > { %s2020_s21 = scalar_select %p1599_p12, 1, 0 }
  0x4a   : > { %s2019_s15 = scalar_select %p1595_p8, 1, 0 }
  0x4b   : > { %s897_s5 = sshll.u32 %s1413_s27, 15  ;;  %s148_s14 = scalar_lea.vmem [#allocation7], %s884_s4 }
  0x4c   : > { %s1607_s13 = scalar_lea.hbm %s2004_s2, %s897_s5  ;;  %s155_s16 = sshll.u32 %s148_s14, 4  ;;  %s1609_s16 = int_to_ptr.vmem [resolvable:$true] %s155_s16 }
  0x4d   : > { %p2021_p2 = scmp.lt.s32.totalorder %s1413_s27, 6  ;;  %s1617_s8 = scalar_lea.sflag [#allocation8], %s144_s9 }
  0x4e   : > { %s1287_s20 = scalar_lea.hbm %s1607_s13, 32768  ;;  %s1292_s4 = scalar_lea.hbm %s2004_s2, 196608 }
  0x4f   : > { %p1613_p13 = pnand %p2021_p2, %p70_p1  ;;  %p1288_p0 = scmp.ne.s32.totalorder %s1607_s13, %s1287_s20 }
  0x50   : > { %p1293_p9 = scmp.lt.u32.totalorder %s1607_s13, %s2004_s2  ;;  %p1294_p10 = scmp.lt.u32.totalorder %s1292_s4, %s1287_s20 }
  0x51   : > { %p1289_p7 = pneg %p1613_p13  ;;  %p1296_p5 = scmp.lt.u32.totalorder %s1287_s20, %s1607_s13 }
  0x52   : > { %p1295_p1 = por %p1294_p10, %p1293_p9 }
  0x53   : > { %p1290_p4 = pnand %p1289_p7, %p1288_p0 }
  0x54   : > { %p1297_p3 = por %p1296_p5, %p1295_p1 }
  0x55   : > { %p1291_p6 = pneg %p1290_p4 }
  0x57   : > { %p1298_p2 = pnand %p1297_p3, %p1291_p6 }
  0x59   : > { %1301 = shalt.err (!%p1298_p2)
}
  0x5a   : > { %s1302_s9 = scalar_lea.vmem %s1609_s16, 32768  ;;  %s1417_s7 = smov [#allocation7]  }
  0x5b   : > { %p1303_p0 = scmp.ne.s32.totalorder %s1609_s16, %s1302_s9  ;;  %s1307_s14 = sshll.u32 %s1417_s7, 4  ;;  %s1308_s14 = int_to_ptr.vmem [resolvable:$false] %s1307_s14 }
  0x5c   : > { %s1309_s25 = scalar_lea.vmem %s1308_s14, 65536  ;;  %p1310_p8 = scmp.lt.s32.totalorder %s1609_s16, %s1308_s14 }
  0x5d   : > { %p1305_p4 = pnand %p1303_p0, %p1289_p7  ;;  %p1311_p9 = scmp.lt.s32.totalorder %s1309_s25, %s1302_s9 }
  0x5f   : > { %p1306_p12 = pneg %p1305_p4  ;;  %p1312_p10 = por %p1311_p9, %p1310_p8 }
  0x61   : > { %p1313_p1 = pnand %p1312_p10, %p1306_p12 }
  0x63   : > { %1316 = shalt.err (!%p1313_p1)
}
  0x64   : > { %s1418_s20 = smov 256   ;;  %s1419_s30 = smov 16  }
  0x65   : > { %1177 = dma.hbm_to_vmem [thread:$0]  (!%p1613_p13), %s1607_s13, 32768, %s1609_s16, %s1617_s8, %s1418_s20, %s1418_s20, %s1419_s30  }
  0x66   : > { %p2023_p7 = scmp.ne.s32.totalorder %s2013_s17, 0 }
  0x67   : > { %s169_s4 = sand.u32 (!%p2023_p7), 1, %s1405_s26   ;;  %p2024_p8 = scmp.ne.s32.totalorder (!%p2023_p7), %s2011_s6, 0 }
  0x68   : > { %167 = sbr.rel (%p2023_p7) target bundleno = 480 (0x1e0), region = 28  ;;  %s888_s5 = sshll.u32 (!%p2023_p7), %s169_s4, 5 }
  0x69   : > { %s170_s18 = scalar_lea.sflag (!%p2023_p7), [#allocation5], %s169_s4  ;;  %s1648_s9 = scalar_lea.vmem (!%p2023_p7), [#allocation4], %s888_s5 }
  0x6f   : > { %1376 = dma.done.wait (%p2024_p8), %s170_s18, 512  }
  0x70   : > { %1378 = vsyncadd (%p2024_p8), %s170_s18, 4294966784  ;;  %s1655_s7 = sand.u32 1, %s1393_s23  }
  0x71   : > { %s889_s17 = sshll.u32 %s1655_s7, 11  ;;  %s179_s13 = scalar_lea.sflag [#allocation8], %s1655_s7 }
  0x72   : > { %s1659_s16 = scalar_lea.vmem [#allocation7], %s889_s17 }
  0x73   : > { %1380 = dma.done.wait (%p1589_p11), %s179_s13, 32768  }
  0x74   : > { %1382 = vsyncadd (%p1589_p11), %s179_s13, 4294934528  ;;  %v214_v0 = vld [vmem:[%s1659_s16 + $0x8] sm:$0xff]  ;;  %v216_v1 = vld [vmem:[%s1659_s16 + $0x18] sm:$0xff]  ;;  %s890_s6 = sshll.u32 %s1655_s7, 3  ;;  %s898_s12 = sshll.u32 %s1487_s28, 7 }
  0x75   : > { %v342_v2 = vld [vmem:[%s1659_s16 + $0x408] sm:$0xff]  ;;  %v899_v3 = vpack.c.bf16 %v216_v1, %v214_v0  ;;  %v344_v4 = vld [vmem:[%s1659_s16 + $0x418] sm:$0xff]  ;;  %v213_v5 = vld [vmem:[%s1659_s16] sm:$0xff]  ;;  %s207_s19 = scalar_lea.vmem [#allocation9], %s890_s6  ;;  %s1950_s20 = scalar_lea.hbm %s2005_s3, %s898_s12 }
  0x76   : > { %v215_v6 = vld [vmem:[%s1659_s16 + $0x10] sm:$0xff]  ;;  %v1027_v7 = vpack.c.bf16 %v344_v4, %v342_v2  ;;  %v341_v9 = vld [vmem:[%s1659_s16 + $0x400] sm:$0xff]  ;;  %v218_v11 = vld [vmem:[%s1659_s16 + $0x28] sm:$0xff]  ;;  %s785_s8 = sshll.u32 %s207_s19, 4  ;;  %s771_s30 = scalar_lea.sflag [#allocation6], %s1655_s7  ;;  %s1952_s8 = int_to_ptr.vmem [resolvable:$true] %s785_s8 }
  0x77   : > { %v901_v8 = vpack.c.bf16 %v215_v6, %v213_v5  ;;  %v343_v10 = vld [vmem:[%s1659_s16 + $0x410] sm:$0xff]  ;;  %900 = vmatprep.subr.bf16.mxu1 %v899_v3  ;;  %v220_v13 = vld [vmem:[%s1659_s16 + $0x38] sm:$0xff]  ;;  %v346_v14 = vld [vmem:[%s1659_s16 + $0x428] sm:$0xff]  ;;  %s1317_s4 = scalar_lea.vmem %s1952_s8, 128  ;;  %p2025_p12 = scmp.ne.s32.totalorder %s2019_s15, 0 }
  0x78   : > { %v1029_v12 = vpack.c.bf16 %v343_v10, %v341_v9  ;;  %v348_v15 = vld [vmem:[%s1659_s16 + $0x438] sm:$0xff]  ;;  %1028 = vmatprep.subr.bf16.mxu0 %v1027_v7  ;;  %v903_v16 = vpack.c.bf16 %v220_v13, %v218_v11  ;;  %v217_v18 = vld [vmem:[%s1659_s16 + $0x20] sm:$0xff]  ;;  %v219_v19 = vld [vmem:[%s1659_s16 + $0x30] sm:$0xff]  ;;  %p1318_p11 = scmp.ne.s32.totalorder %s1952_s8, %s1317_s4  ;;  %s1420_s28 = smov [#allocation9]  }
  0x79   : > { %902 = vmatpush1.bf16.msra.mxu1 %v901_v8  ;;  %v1031_v17 = vpack.c.bf16 %v348_v15, %v346_v14  ;;  %v345_v20 = vld [vmem:[%s1659_s16 + $0x420] sm:$0xff]  ;;  %v905_v21 = vpack.c.bf16 %v219_v19, %v217_v18  ;;  %v347_v22 = vld [vmem:[%s1659_s16 + $0x430] sm:$0xff]  ;;  %v222_v23 = vld [vmem:[%s1659_s16 + $0x48] sm:$0xff]  ;;  %s1321_s5 = sshll.u32 %s1420_s28, 4  ;;  %s1322_s5 = int_to_ptr.vmem [resolvable:$false] %s1321_s5 }
  0x7a   : > { %1030 = vmatpush1.bf16.msra.mxu0 %v1029_v12  ;;  %v224_v24 = vld [vmem:[%s1659_s16 + $0x58] sm:$0xff]  ;;  %904 = vmatprep.subr.bf16.mxu1 %v903_v16  ;;  %v1033_v25 = vpack.c.bf16 %v347_v22, %v345_v20  ;;  %v350_v27 = vld [vmem:[%s1659_s16 + $0x448] sm:$0xff]  ;;  %v221_v29 = vld [vmem:[%s1659_s16 + $0x40] sm:$0xff]  ;;  %p1319_p13 = pnand %p1318_p11, %p2025_p12  ;;  %s1323_s18 = scalar_lea.vmem %s1322_s5, 256 }
  0x7b   : > { %1032 = vmatprep.subr.bf16.mxu0 %v1031_v17  ;;  %v907_v26 = vpack.c.bf16 %v224_v24, %v222_v23  ;;  %v352_v28 = vld [vmem:[%s1659_s16 + $0x458] sm:$0xff]  ;;  %v223_v31 = vld [vmem:[%s1659_s16 + $0x50] sm:$0xff]  ;;  %v349_v32 = vld [vmem:[%s1659_s16 + $0x440] sm:$0xff]  ;;  %p1324_p5 = scmp.lt.s32.totalorder %s1952_s8, %s1322_s5  ;;  %p1325_p3 = scmp.lt.s32.totalorder %s1323_s18, %s1317_s4 }
  0x7c   : > { %v1035_v30 = vpack.c.bf16 %v352_v28, %v350_v27  ;;  %v351_v33 = vld [vmem:[%s1659_s16 + $0x450] sm:$0xff]  ;;  %v909_v34 = vpack.c.bf16 %v223_v31, %v221_v29  ;;  %v226_v35 = vld [vmem:[%s1659_s16 + $0x68] sm:$0xff]  ;;  %v228_v36 = vld [vmem:[%s1659_s16 + $0x78] sm:$0xff]  ;;  %p1320_p6 = pneg %p1319_p13 }
  0x7d   : > { %906 = vmatpush1.bf16.msra.mxu1 %v905_v21  ;;  %v354_v37 = vld [vmem:[%s1659_s16 + $0x468] sm:$0xff]  ;;  %v1037_v38 = vpack.c.bf16 %v351_v33, %v349_v32  ;;  %v911_v39 = vpack.c.bf16 %v228_v36, %v226_v35  ;;  %v356_v40 = vld [vmem:[%s1659_s16 + $0x478] sm:$0xff]  ;;  %v225_v41 = vld [vmem:[%s1659_s16 + $0x60] sm:$0xff]  ;;  %p1326_p2 = por %p1325_p3, %p1324_p5 }
  0x7e   : > { %1034 = vmatpush1.bf16.msra.mxu0 %v1033_v25  ;;  %908 = vmatprep.subr.bf16.mxu1 %v907_v26  ;;  %v227_v42 = vld [vmem:[%s1659_s16 + $0x70] sm:$0xff]  ;;  %v1039_v43 = vpack.c.bf16 %v356_v40, %v354_v37  ;;  %v353_v44 = vld [vmem:[%s1659_s16 + $0x460] sm:$0xff]  ;;  %v230_v46 = vld [vmem:[%s1659_s16 + $0x88] sm:$0xff] }
  0x7f   : > { %1036 = vmatprep.subr.bf16.mxu0 %v1035_v30  ;;  %v355_v45 = vld [vmem:[%s1659_s16 + $0x470] sm:$0xff]  ;;  %v232_v47 = vld [vmem:[%s1659_s16 + $0x98] sm:$0xff]  ;;  %v358_v48 = vld [vmem:[%s1659_s16 + $0x488] sm:$0xff]  ;;  %v913_v50 = vpack.c.bf16 %v227_v42, %v225_v41  ;;  %p1327_p0 = pnand %p1326_p2, %p1320_p6 }
  0x80   : > { %v360_v49 = vld [vmem:[%s1659_s16 + $0x498] sm:$0xff]  ;;  %v1041_v51 = vpack.c.bf16 %v355_v45, %v353_v44  ;;  %v915_v52 = vpack.c.bf16 %v232_v47, %v230_v46  ;;  %v229_v53 = vld [vmem:[%s1659_s16 + $0x80] sm:$0xff]  ;;  %v231_v54 = vld [vmem:[%s1659_s16 + $0x90] sm:$0xff] }
  0x81   : > { %910 = vmatpush1.bf16.msra.mxu1 %v909_v34  ;;  %v357_v55 = vld [vmem:[%s1659_s16 + $0x480] sm:$0xff]  ;;  %v1043_v56 = vpack.c.bf16 %v360_v49, %v358_v48  ;;  %v359_v57 = vld [vmem:[%s1659_s16 + $0x490] sm:$0xff]  ;;  %v234_v58 = vld [vmem:[%s1659_s16 + $0xa8] sm:$0xff]  ;;  %v917_v62 = vpack.c.bf16 %v231_v54, %v229_v53 }
  0x82   : > { %1038 = vmatpush1.bf16.msra.mxu0 %v1037_v38  ;;  %912 = vmatprep.subr.bf16.mxu1 %v911_v39  ;;  %v236_v59 = vld [vmem:[%s1659_s16 + $0xb8] sm:$0xff]  ;;  %v362_v60 = vld [vmem:[%s1659_s16 + $0x4a8] sm:$0xff]  ;;  %v1045_v63 = vpack.c.bf16 %v359_v57, %v357_v55  ;;  %v233_v1 = vld [vmem:[%s1659_s16 + $0xa0] sm:$0xff] }
  0x83   : > { %1040 = vmatprep.subr.bf16.mxu0 %v1039_v43  ;;  %v364_v61 = vld [vmem:[%s1659_s16 + $0x4b8] sm:$0xff]  ;;  %v919_v0 = vpack.c.bf16 %v236_v59, %v234_v58  ;;  %v235_v2 = vld [vmem:[%s1659_s16 + $0xb0] sm:$0xff]  ;;  %v361_v3 = vld [vmem:[%s1659_s16 + $0x4a0] sm:$0xff] }
  0x84   : > { %v1047_v4 = vpack.c.bf16 %v364_v61, %v362_v60  ;;  %v363_v5 = vld [vmem:[%s1659_s16 + $0x4b0] sm:$0xff]  ;;  %v238_v6 = vld [vmem:[%s1659_s16 + $0xc8] sm:$0xff]  ;;  %v240_v7 = vld [vmem:[%s1659_s16 + $0xd8] sm:$0xff]  ;;  %v921_v10 = vpack.c.bf16 %v235_v2, %v233_v1 }
  0x85   : > { %914 = vmatpush1.bf16.msra.mxu1 %v913_v50  ;;  %v366_v8 = vld [vmem:[%s1659_s16 + $0x4c8] sm:$0xff]  ;;  %v368_v9 = vld [vmem:[%s1659_s16 + $0x4d8] sm:$0xff]  ;;  %v1049_v11 = vpack.c.bf16 %v363_v5, %v361_v3  ;;  %v923_v12 = vpack.c.bf16 %v240_v7, %v238_v6  ;;  %v237_v13 = vld [vmem:[%s1659_s16 + $0xc0] sm:$0xff] }
  0x86   : > { %1042 = vmatpush1.bf16.msra.mxu0 %v1041_v51  ;;  %916 = vmatprep.subr.bf16.mxu1 %v915_v52  ;;  %v239_v14 = vld [vmem:[%s1659_s16 + $0xd0] sm:$0xff]  ;;  %v365_v15 = vld [vmem:[%s1659_s16 + $0x4c0] sm:$0xff]  ;;  %v1051_v16 = vpack.c.bf16 %v368_v9, %v366_v8  ;;  %v242_v18 = vld [vmem:[%s1659_s16 + $0xe8] sm:$0xff] }
  0x87   : > { %1044 = vmatprep.subr.bf16.mxu0 %v1043_v56  ;;  %v367_v17 = vld [vmem:[%s1659_s16 + $0x4d0] sm:$0xff]  ;;  %v244_v19 = vld [vmem:[%s1659_s16 + $0xf8] sm:$0xff]  ;;  %v370_v20 = vld [vmem:[%s1659_s16 + $0x4e8] sm:$0xff]  ;;  %v925_v22 = vpack.c.bf16 %v239_v14, %v237_v13 }
  0x88   : > { %v372_v21 = vld [vmem:[%s1659_s16 + $0x4f8] sm:$0xff]  ;;  %v1053_v23 = vpack.c.bf16 %v367_v17, %v365_v15  ;;  %v927_v24 = vpack.c.bf16 %v244_v19, %v242_v18  ;;  %v241_v25 = vld [vmem:[%s1659_s16 + $0xe0] sm:$0xff]  ;;  %v243_v26 = vld [vmem:[%s1659_s16 + $0xf0] sm:$0xff] }
  0x89   : > { %918 = vmatpush1.bf16.msra.mxu1 %v917_v62  ;;  %v369_v27 = vld [vmem:[%s1659_s16 + $0x4e0] sm:$0xff]  ;;  %v1055_v28 = vpack.c.bf16 %v372_v21, %v370_v20  ;;  %v371_v29 = vld [vmem:[%s1659_s16 + $0x4f0] sm:$0xff]  ;;  %v246_v30 = vld [vmem:[%s1659_s16 + $0x108] sm:$0xff]  ;;  %v929_v34 = vpack.c.bf16 %v243_v26, %v241_v25 }
  0x8a   : > { %1046 = vmatpush1.bf16.msra.mxu0 %v1045_v63  ;;  %920 = vmatprep.subr.bf16.mxu1 %v919_v0  ;;  %v248_v31 = vld [vmem:[%s1659_s16 + $0x118] sm:$0xff]  ;;  %v374_v32 = vld [vmem:[%s1659_s16 + $0x508] sm:$0xff]  ;;  %v1057_v35 = vpack.c.bf16 %v371_v29, %v369_v27  ;;  %v245_v37 = vld [vmem:[%s1659_s16 + $0x100] sm:$0xff] }
  0x8b   : > { %1048 = vmatprep.subr.bf16.mxu0 %v1047_v4  ;;  %v376_v33 = vld [vmem:[%s1659_s16 + $0x518] sm:$0xff]  ;;  %v931_v36 = vpack.c.bf16 %v248_v31, %v246_v30  ;;  %v247_v38 = vld [vmem:[%s1659_s16 + $0x110] sm:$0xff]  ;;  %v373_v39 = vld [vmem:[%s1659_s16 + $0x500] sm:$0xff] }
  0x8c   : > { %v1059_v40 = vpack.c.bf16 %v376_v33, %v374_v32  ;;  %v375_v41 = vld [vmem:[%s1659_s16 + $0x510] sm:$0xff]  ;;  %v250_v42 = vld [vmem:[%s1659_s16 + $0x128] sm:$0xff]  ;;  %v252_v43 = vld [vmem:[%s1659_s16 + $0x138] sm:$0xff]  ;;  %v933_v46 = vpack.c.bf16 %v247_v38, %v245_v37 }
  0x8d   : > { %922 = vmatpush1.bf16.msra.mxu1 %v921_v10  ;;  %v378_v44 = vld [vmem:[%s1659_s16 + $0x528] sm:$0xff]  ;;  %v380_v45 = vld [vmem:[%s1659_s16 + $0x538] sm:$0xff]  ;;  %v1061_v47 = vpack.c.bf16 %v375_v41, %v373_v39  ;;  %v935_v48 = vpack.c.bf16 %v252_v43, %v250_v42  ;;  %v249_v49 = vld [vmem:[%s1659_s16 + $0x120] sm:$0xff] }
  0x8e   : > { %1050 = vmatpush1.bf16.msra.mxu0 %v1049_v11  ;;  %924 = vmatprep.subr.bf16.mxu1 %v923_v12  ;;  %v251_v50 = vld [vmem:[%s1659_s16 + $0x130] sm:$0xff]  ;;  %v377_v51 = vld [vmem:[%s1659_s16 + $0x520] sm:$0xff]  ;;  %v1063_v52 = vpack.c.bf16 %v380_v45, %v378_v44  ;;  %v254_v54 = vld [vmem:[%s1659_s16 + $0x148] sm:$0xff] }
  0x8f   : > { %1052 = vmatprep.subr.bf16.mxu0 %v1051_v16  ;;  %v379_v53 = vld [vmem:[%s1659_s16 + $0x530] sm:$0xff]  ;;  %v256_v55 = vld [vmem:[%s1659_s16 + $0x158] sm:$0xff]  ;;  %v382_v56 = vld [vmem:[%s1659_s16 + $0x548] sm:$0xff]  ;;  %v937_v58 = vpack.c.bf16 %v251_v50, %v249_v49 }
  0x90   : > { %v384_v57 = vld [vmem:[%s1659_s16 + $0x558] sm:$0xff]  ;;  %v1065_v59 = vpack.c.bf16 %v379_v53, %v377_v51  ;;  %v939_v60 = vpack.c.bf16 %v256_v55, %v254_v54  ;;  %v253_v61 = vld [vmem:[%s1659_s16 + $0x140] sm:$0xff]  ;;  %v255_v62 = vld [vmem:[%s1659_s16 + $0x150] sm:$0xff] }
  0x91   : > { %926 = vmatpush1.bf16.msra.mxu1 %v925_v22  ;;  %v381_v63 = vld [vmem:[%s1659_s16 + $0x540] sm:$0xff]  ;;  %v1067_v0 = vpack.c.bf16 %v384_v57, %v382_v56  ;;  %v383_v1 = vld [vmem:[%s1659_s16 + $0x550] sm:$0xff]  ;;  %v258_v2 = vld [vmem:[%s1659_s16 + $0x168] sm:$0xff]  ;;  %v941_v6 = vpack.c.bf16 %v255_v62, %v253_v61 }
  0x92   : > { %1054 = vmatpush1.bf16.msra.mxu0 %v1053_v23  ;;  %928 = vmatprep.subr.bf16.mxu1 %v927_v24  ;;  %v260_v3 = vld [vmem:[%s1659_s16 + $0x178] sm:$0xff]  ;;  %v386_v4 = vld [vmem:[%s1659_s16 + $0x568] sm:$0xff]  ;;  %v257_v7 = vld [vmem:[%s1659_s16 + $0x160] sm:$0xff]  ;;  %v1069_v8 = vpack.c.bf16 %v383_v1, %v381_v63 }
  0x93   : > { %1056 = vmatprep.subr.bf16.mxu0 %v1055_v28  ;;  %v388_v5 = vld [vmem:[%s1659_s16 + $0x578] sm:$0xff]  ;;  %v943_v9 = vpack.c.bf16 %v260_v3, %v258_v2  ;;  %v259_v10 = vld [vmem:[%s1659_s16 + $0x170] sm:$0xff]  ;;  %v385_v11 = vld [vmem:[%s1659_s16 + $0x560] sm:$0xff] }
  0x94   : > { %v387_v12 = vld [vmem:[%s1659_s16 + $0x570] sm:$0xff]  ;;  %v1071_v13 = vpack.c.bf16 %v388_v5, %v386_v4  ;;  %v262_v14 = vld [vmem:[%s1659_s16 + $0x188] sm:$0xff]  ;;  %v264_v15 = vld [vmem:[%s1659_s16 + $0x198] sm:$0xff]  ;;  %v945_v21 = vpack.c.bf16 %v259_v10, %v257_v7 }
  0x95   : > { %930 = vmatpush1.bf16.msra.mxu1 %v929_v34  ;;  %v1764_v16 = vld [vmem:[%s1648_s9] sm:$0xff]  ;;  %v390_v17 = vld [vmem:[%s1659_s16 + $0x588] sm:$0xff]  ;;  %v392_v18 = vld [vmem:[%s1659_s16 + $0x598] sm:$0xff]  ;;  %v1073_v23 = vpack.c.bf16 %v387_v12, %v385_v11  ;;  %v947_v24 = vpack.c.bf16 %v264_v15, %v262_v14 }
  0x96   : > { %1058 = vmatpush1.bf16.msra.mxu0 %v1057_v35  ;;  %932 = vmatprep.subr.bf16.mxu1 %v931_v36  ;;  %v473_v19 = vcombine.high %v1764_v16, %v1764_v16  ;;  %v1771_v20 = vld [vmem:[%s1648_s9 + $0x10] sm:$0xff]  ;;  %v261_v25 = vld [vmem:[%s1659_s16 + $0x180] sm:$0xff]  ;;  %v1075_v28 = vpack.c.bf16 %v392_v18, %v390_v17  ;;  %v266_v30 = vld [vmem:[%s1659_s16 + $0x1a8] sm:$0xff] }
  0x97   : > { %1060 = vmatprep.subr.bf16.mxu0 %v1059_v40  ;;  %v475_v22 = vcombine.high %v1771_v20, %v1771_v20  ;;  %v263_v26 = vld [vmem:[%s1659_s16 + $0x190] sm:$0xff]  ;;  %v389_v27 = vld [vmem:[%s1659_s16 + $0x580] sm:$0xff]  ;;  %v268_v31 = vld [vmem:[%s1659_s16 + $0x1b8] sm:$0xff] }
  0x98   : > { %v391_v29 = vld [vmem:[%s1659_s16 + $0x590] sm:$0xff]  ;;  %545 = vmatprep.mubr.f32.mxu1 %v473_v19  ;;  %v394_v32 = vld [vmem:[%s1659_s16 + $0x5a8] sm:$0xff]  ;;  %v396_v33 = vld [vmem:[%s1659_s16 + $0x5b8] sm:$0xff]  ;;  %v949_v34 = vpack.c.bf16 %v263_v26, %v261_v25  ;;  %v951_v36 = vpack.c.bf16 %v268_v31, %v266_v30 }
  0x99   : > { %934 = vmatpush1.bf16.msra.mxu1 %v933_v46  ;;  %687 = vmatprep.mubr.f32.mxu0 %v475_v22  ;;  %v1077_v35 = vpack.c.bf16 %v391_v29, %v389_v27  ;;  %v265_v37 = vld [vmem:[%s1659_s16 + $0x1a0] sm:$0xff]  ;;  %v267_v38 = vld [vmem:[%s1659_s16 + $0x1b0] sm:$0xff]  ;;  %v1079_v40 = vpack.c.bf16 %v396_v33, %v394_v32  ;;  %v270_v42 = vld [vmem:[%s1659_s16 + $0x1c8] sm:$0xff] }
  0x9a   : > { %1062 = vmatpush1.bf16.msra.mxu0 %v1061_v47  ;;  %936 = vmatprep.subr.bf16.mxu1 %v935_v48  ;;  %v393_v39 = vld [vmem:[%s1659_s16 + $0x5a0] sm:$0xff]  ;;  %v395_v41 = vld [vmem:[%s1659_s16 + $0x5b0] sm:$0xff]  ;;  %v272_v43 = vld [vmem:[%s1659_s16 + $0x1d8] sm:$0xff]  ;;  %v953_v46 = vpack.c.bf16 %v267_v38, %v265_v37 }
  0x9b   : > { %1064 = vmatprep.subr.bf16.mxu0 %v1063_v52  ;;  %v398_v44 = vld [vmem:[%s1659_s16 + $0x5c8] sm:$0xff]  ;;  %v400_v45 = vld [vmem:[%s1659_s16 + $0x5d8] sm:$0xff]  ;;  %v1081_v47 = vpack.c.bf16 %v395_v41, %v393_v39  ;;  %v955_v48 = vpack.c.bf16 %v272_v43, %v270_v42  ;;  %v269_v49 = vld [vmem:[%s1659_s16 + $0x1c0] sm:$0xff] }
  0x9c   : > { %v271_v50 = vld [vmem:[%s1659_s16 + $0x1d0] sm:$0xff]  ;;  %v397_v51 = vld [vmem:[%s1659_s16 + $0x5c0] sm:$0xff]  ;;  %v1083_v52 = vpack.c.bf16 %v400_v45, %v398_v44  ;;  %v274_v54 = vld [vmem:[%s1659_s16 + $0x1e8] sm:$0xff] }
  0x9d   : > { %938 = vmatpush1.bf16.msra.mxu1 %v937_v58  ;;  %v399_v53 = vld [vmem:[%s1659_s16 + $0x5d0] sm:$0xff]  ;;  %v276_v55 = vld [vmem:[%s1659_s16 + $0x1f8] sm:$0xff]  ;;  %v402_v56 = vld [vmem:[%s1659_s16 + $0x5e8] sm:$0xff]  ;;  %v957_v58 = vpack.c.bf16 %v271_v50, %v269_v49 }
  0x9e   : > { %1066 = vmatpush1.bf16.msra.mxu0 %v1065_v59  ;;  %940 = vmatprep.subr.bf16.mxu1 %v939_v60  ;;  %v404_v57 = vld [vmem:[%s1659_s16 + $0x5f8] sm:$0xff]  ;;  %v1085_v59 = vpack.c.bf16 %v399_v53, %v397_v51  ;;  %v959_v60 = vpack.c.bf16 %v276_v55, %v274_v54  ;;  %v273_v61 = vld [vmem:[%s1659_s16 + $0x1e0] sm:$0xff]  ;;  %v275_v62 = vld [vmem:[%s1659_s16 + $0x1f0] sm:$0xff] }
  0x9f   : > { %1068 = vmatprep.subr.bf16.mxu0 %v1067_v0  ;;  %v401_v63 = vld [vmem:[%s1659_s16 + $0x5e0] sm:$0xff]  ;;  %v1087_v0 = vpack.c.bf16 %v404_v57, %v402_v56  ;;  %v403_v1 = vld [vmem:[%s1659_s16 + $0x5f0] sm:$0xff]  ;;  %v278_v2 = vld [vmem:[%s1659_s16 + $0x208] sm:$0xff] }
  0xa0   : > { %v280_v3 = vld [vmem:[%s1659_s16 + $0x218] sm:$0xff]  ;;  %v406_v4 = vld [vmem:[%s1659_s16 + $0x608] sm:$0xff]  ;;  %v1089_v7 = vpack.c.bf16 %v403_v1, %v401_v63  ;;  %v279_v10 = vld [vmem:[%s1659_s16 + $0x210] sm:$0xff] }
  0xa1   : > { %942 = vmatpush1.bf16.msra.mxu1 %v941_v6  ;;  %v408_v5 = vld [vmem:[%s1659_s16 + $0x618] sm:$0xff]  ;;  %v961_v6 = vpack.c.bf16 %v275_v62, %v273_v61  ;;  %v405_v11 = vld [vmem:[%s1659_s16 + $0x600] sm:$0xff]  ;;  %v282_v14 = vld [vmem:[%s1659_s16 + $0x228] sm:$0xff] }
  0xa2   : > { %1070 = vmatpush1.bf16.msra.mxu0 %v1069_v8  ;;  %944 = vmatprep.subr.bf16.mxu1 %v943_v9  ;;  %v963_v8 = vpack.c.bf16 %v280_v3, %v278_v2  ;;  %v277_v9 = vld [vmem:[%s1659_s16 + $0x200] sm:$0xff]  ;;  %v1091_v12 = vpack.c.bf16 %v408_v5, %v406_v4  ;;  %v284_v15 = vld [vmem:[%s1659_s16 + $0x238] sm:$0xff]  ;;  %v410_v17 = vld [vmem:[%s1659_s16 + $0x628] sm:$0xff] }
  0xa3   : > { %1072 = vmatprep.subr.bf16.mxu0 %v1071_v13  ;;  %v407_v13 = vld [vmem:[%s1659_s16 + $0x610] sm:$0xff]  ;;  %v412_v18 = vld [vmem:[%s1659_s16 + $0x638] sm:$0xff]  ;;  %v965_v19 = vpack.c.bf16 %v279_v10, %v277_v9  ;;  %v967_v22 = vpack.c.bf16 %v284_v15, %v282_v14  ;;  %v409_v25 = vld [vmem:[%s1659_s16 + $0x620] sm:$0xff] }
  0xa4   : > { %v1095_v26 = vpack.c.bf16 %v412_v18, %v410_v17  ;;  %v411_v27 = vld [vmem:[%s1659_s16 + $0x630] sm:$0xff]  ;;  %v288_v29 = vld [vmem:[%s1659_s16 + $0x258] sm:$0xff]  ;;  %v414_v30 = vld [vmem:[%s1659_s16 + $0x648] sm:$0xff] }
  0xa5   : > { %946 = vmatpush1.bf16.msra.mxu1 %v945_v21  ;;  %v1093_v21 = vpack.c.bf16 %v407_v13, %v405_v11  ;;  %v416_v31 = vld [vmem:[%s1659_s16 + $0x658] sm:$0xff]  ;;  %v1097_v33 = vpack.c.bf16 %v411_v27, %v409_v25  ;;  %v413_v37 = vld [vmem:[%s1659_s16 + $0x640] sm:$0xff]  ;;  %v415_v38 = vld [vmem:[%s1659_s16 + $0x650] sm:$0xff] }
  0xa6   : > { %1074 = vmatpush1.bf16.msra.mxu0 %v1073_v23  ;;  %948 = vmatprep.subr.bf16.mxu1 %v947_v24  ;;  %v281_v23 = vld [vmem:[%s1659_s16 + $0x220] sm:$0xff]  ;;  %v283_v24 = vld [vmem:[%s1659_s16 + $0x230] sm:$0xff]  ;;  %v290_v39 = vld [vmem:[%s1659_s16 + $0x268] sm:$0xff]  ;;  %v1101_v43 = vpack.c.bf16 %v415_v38, %v413_v37 }
  0xa7   : > { %1076 = vmatprep.subr.bf16.mxu0 %v1075_v28  ;;  %v286_v28 = vld [vmem:[%s1659_s16 + $0x248] sm:$0xff]  ;;  %v969_v32 = vpack.c.bf16 %v283_v24, %v281_v23  ;;  %v420_v41 = vld [vmem:[%s1659_s16 + $0x678] sm:$0xff]  ;;  %v289_v45 = vld [vmem:[%s1659_s16 + $0x260] sm:$0xff] }
  0xa8   : > { %v419_v49 = vld [vmem:[%s1659_s16 + $0x670] sm:$0xff]  ;;  %v294_v50 = vld [vmem:[%s1659_s16 + $0x288] sm:$0xff]  ;;  %v296_v51 = vld [vmem:[%s1659_s16 + $0x298] sm:$0xff] }
  0xa9   : > { %950 = vmatpush1.bf16.msra.mxu1 %v949_v34  ;;  %v971_v34 = vpack.c.bf16 %v288_v29, %v286_v28  ;;  %v424_v53 = vld [vmem:[%s1659_s16 + $0x698] sm:$0xff]  ;;  %v979_v56 = vpack.c.bf16 %v296_v51, %v294_v50  ;;  %v293_v57 = vld [vmem:[%s1659_s16 + $0x280] sm:$0xff]  ;;  %v423_v61 = vld [vmem:[%s1659_s16 + $0x690] sm:$0xff] }
  0xaa   : > { %1078 = vmatpush1.bf16.msra.mxu0 %v1077_v35  ;;  %952 = vmatprep.subr.bf16.mxu1 %v951_v36  ;;  %v285_v35 = vld [vmem:[%s1659_s16 + $0x240] sm:$0xff]  ;;  %v287_v36 = vld [vmem:[%s1659_s16 + $0x250] sm:$0xff]  ;;  %v298_v62 = vld [vmem:[%s1659_s16 + $0x2a8] sm:$0xff] }
  0xab   : > { %1080 = vmatprep.subr.bf16.mxu0 %v1079_v40  ;;  %v292_v40 = vld [vmem:[%s1659_s16 + $0x278] sm:$0xff]  ;;  %v973_v42 = vpack.c.bf16 %v287_v36, %v285_v35  ;;  %v297_v5 = vld [vmem:[%s1659_s16 + $0x2a0] sm:$0xff]  ;;  %v427_v9 = vld [vmem:[%s1659_s16 + $0x6b0] sm:$0xff] }
  0xac   : > { %v975_v44 = vpack.c.bf16 %v292_v40, %v290_v39  ;;  %v300_v63 = vld [vmem:[%s1659_s16 + $0x2b8] sm:$0xff]  ;;  %v302_v10 = vld [vmem:[%s1659_s16 + $0x2c8] sm:$0xff]  ;;  %v301_v15 = vld [vmem:[%s1659_s16 + $0x2c0] sm:$0xff] }
  0xad   : > { %954 = vmatpush1.bf16.msra.mxu1 %v953_v46  ;;  %v291_v46 = vld [vmem:[%s1659_s16 + $0x270] sm:$0xff]  ;;  %v428_v1 = vld [vmem:[%s1659_s16 + $0x6b8] sm:$0xff]  ;;  %v983_v4 = vpack.c.bf16 %v300_v63, %v298_v62  ;;  %v306_v23 = vld [vmem:[%s1659_s16 + $0x2e8] sm:$0xff] }
  0xae   : > { %1082 = vmatpush1.bf16.msra.mxu0 %v1081_v47  ;;  %956 = vmatprep.subr.bf16.mxu1 %v955_v48  ;;  %v417_v47 = vld [vmem:[%s1659_s16 + $0x660] sm:$0xff]  ;;  %v977_v54 = vpack.c.bf16 %v291_v46, %v289_v45  ;;  %v304_v11 = vld [vmem:[%s1659_s16 + $0x2d8] sm:$0xff]  ;;  %v303_v17 = vld [vmem:[%s1659_s16 + $0x2d0] sm:$0xff] }
  0xaf   : > { %1084 = vmatprep.subr.bf16.mxu0 %v1083_v52  ;;  %v422_v52 = vld [vmem:[%s1659_s16 + $0x688] sm:$0xff]  ;;  %v1105_v55 = vpack.c.bf16 %v419_v49, %v417_v47  ;;  %v432_v13 = vld [vmem:[%s1659_s16 + $0x6d8] sm:$0xff]  ;;  %v305_v35 = vld [vmem:[%s1659_s16 + $0x2e0] sm:$0xff] }
  0xb0   : > { %v308_v25 = vld [vmem:[%s1659_s16 + $0x2f8] sm:$0xff]  ;;  %v434_v28 = vld [vmem:[%s1659_s16 + $0x6e8] sm:$0xff]  ;;  %v307_v36 = vld [vmem:[%s1659_s16 + $0x2f0] sm:$0xff] }
  0xb1   : > { %958 = vmatpush1.bf16.msra.mxu1 %v957_v58  ;;  %v295_v58 = vld [vmem:[%s1659_s16 + $0x290] sm:$0xff]  ;;  %v1867_v27 = vld [vmem:[%s1648_s9 + $0x18] sm:$0xff]  ;;  %v433_v37 = vld [vmem:[%s1659_s16 + $0x6e0] sm:$0xff] }
  0xb2   : > { %1086 = vmatpush1.bf16.msra.mxu0 %v1085_v59  ;;  %960 = vmatprep.subr.bf16.mxu1 %v959_v60  ;;  %v421_v59 = vld [vmem:[%s1659_s16 + $0x680] sm:$0xff]  ;;  %v1107_v60 = vpack.c.bf16 %v424_v53, %v422_v52  ;;  %v981_v2 = vpack.c.bf16 %v295_v58, %v293_v57  ;;  %v436_v29 = vld [vmem:[%s1659_s16 + $0x6f8] sm:$0xff]  ;;  %v435_v38 = vld [vmem:[%s1659_s16 + $0x6f0] sm:$0xff] }
  0xb3   : > { %1088 = vmatprep.subr.bf16.mxu0 %v1087_v0  ;;  %v426_v0 = vld [vmem:[%s1659_s16 + $0x6a8] sm:$0xff]  ;;  %v1109_v3 = vpack.c.bf16 %v423_v61, %v421_v59  ;;  %v312_v40 = vld [vmem:[%s1659_s16 + $0x318] sm:$0xff]  ;;  %v309_v45 = vld [vmem:[%s1659_s16 + $0x300] sm:$0xff] }
  0xb4   : > { %v310_v39 = vld [vmem:[%s1659_s16 + $0x308] sm:$0xff]  ;;  %v311_v46 = vld [vmem:[%s1659_s16 + $0x310] sm:$0xff]  ;;  %v437_v47 = vld [vmem:[%s1659_s16 + $0x700] sm:$0xff] }
  0xb5   : > { %962 = vmatpush1.bf16.msra.mxu1 %v961_v6  ;;  %v299_v6 = vld [vmem:[%s1659_s16 + $0x2b0] sm:$0xff]  ;;  %v314_v50 = vld [vmem:[%s1659_s16 + $0x328] sm:$0xff]  ;;  %v316_v51 = vld [vmem:[%s1659_s16 + $0x338] sm:$0xff] }
  0xb6   : > { %1090 = vmatpush1.bf16.msra.mxu0 %v1089_v7  ;;  %964 = vmatprep.subr.bf16.mxu1 %v963_v8  ;;  %v425_v7 = vld [vmem:[%s1659_s16 + $0x6a0] sm:$0xff]  ;;  %v1111_v8 = vpack.c.bf16 %v428_v1, %v426_v0  ;;  %v985_v14 = vpack.c.bf16 %v299_v6, %v297_v5  ;;  %v439_v49 = vld [vmem:[%s1659_s16 + $0x710] sm:$0xff]  ;;  %v442_v52 = vld [vmem:[%s1659_s16 + $0x728] sm:$0xff] }
  0xb7   : > { %1092 = vmatprep.subr.bf16.mxu0 %v1091_v12  ;;  %v430_v12 = vld [vmem:[%s1659_s16 + $0x6c8] sm:$0xff]  ;;  %v1113_v18 = vpack.c.bf16 %v427_v9, %v425_v7  ;;  %v444_v53 = vld [vmem:[%s1659_s16 + $0x738] sm:$0xff]  ;;  %v313_v57 = vld [vmem:[%s1659_s16 + $0x320] sm:$0xff] }
  0xb8   : > { %546 = vmatmul.mubr.f32.vlgmr.msra.gmra.mrb[0].mxu1 %v1764_v16  ;;  %v1099_v16 = vpack.c.bf16 %v416_v31, %v414_v30  ;;  %v1115_v24 = vpack.c.bf16 %v432_v13, %v430_v12  ;;  %v476_v31 = vcombine.high %v1867_v27, %v1867_v27  ;;  %v315_v58 = vld [vmem:[%s1659_s16 + $0x330] sm:$0xff]  ;;  %v441_v59 = vld [vmem:[%s1659_s16 + $0x720] sm:$0xff]  ;;  %v318_v62 = vld [vmem:[%s1659_s16 + $0x348] sm:$0xff] }
  0xb9   : > { %966 = vmatpush1.bf16.msra.mxu1 %v965_v19  ;;  %688 = vmatmul.mubr.f32.vlgmr.msra.gmra.mrb[0].mxu0 %v1771_v20  ;;  %v418_v20 = vld [vmem:[%s1659_s16 + $0x668] sm:$0xff]  ;;  %v987_v19 = vpack.c.bf16 %v304_v11, %v302_v10  ;;  %v443_v61 = vld [vmem:[%s1659_s16 + $0x730] sm:$0xff]  ;;  %v320_v63 = vld [vmem:[%s1659_s16 + $0x358] sm:$0xff] }
  0xba   : > { %1094 = vmatpush1.bf16.msra.mxu0 %v1093_v21  ;;  %968 = vmatprep.subr.bf16.mxu1 %v967_v22  ;;  %v1103_v48 = vpack.c.bf16 %v420_v41, %v418_v20  ;;  %v429_v21 = vld [vmem:[%s1659_s16 + $0x6c0] sm:$0xff]  ;;  %v431_v22 = vld [vmem:[%s1659_s16 + $0x6d0] sm:$0xff]  ;;  %v438_v20 = vld [vmem:[%s1659_s16 + $0x708] sm:$0xff] }
  0xbb   : > { %1096 = vmatprep.subr.bf16.mxu0 %v1095_v26  ;;  %v1864_v26 = vld [vmem:[%s1648_s9 + $0x8] sm:$0xff]  ;;  %v440_v41 = vld [vmem:[%s1659_s16 + $0x718] sm:$0xff]  ;;  %758 = vmatprep.mubr.f32.mxu0 %v476_v31  ;;  %v317_v5 = vld [vmem:[%s1659_s16 + $0x340] sm:$0xff] }
  0xbc   : > { %v474_v30 = vcombine.high %v1864_v26, %v1864_v26  ;;  %v446_v0 = vld [vmem:[%s1659_s16 + $0x748] sm:$0xff]  ;;  %v448_v1 = vld [vmem:[%s1659_s16 + $0x758] sm:$0xff]  ;;  %v319_v6 = vld [vmem:[%s1659_s16 + $0x350] sm:$0xff] }
  0xbd   : > { %970 = vmatpush1.bf16.msra.mxu1 %v969_v32  ;;  %v989_v32 = vpack.c.bf16 %v303_v17, %v301_v15  ;;  %v445_v7 = vld [vmem:[%s1659_s16 + $0x740] sm:$0xff]  ;;  %v447_v9 = vld [vmem:[%s1659_s16 + $0x750] sm:$0xff]  ;;  %v322_v10 = vld [vmem:[%s1659_s16 + $0x368] sm:$0xff] }
  0xbe   : > { %1098 = vmatpush1.bf16.msra.mxu0 %v1097_v33  ;;  %972 = vmatprep.subr.bf16.mxu1 %v971_v34  ;;  %v1117_v33 = vpack.c.bf16 %v431_v22, %v429_v21  ;;  %v991_v34 = vpack.c.bf16 %v308_v25, %v306_v23  ;;  %v324_v11 = vld [vmem:[%s1659_s16 + $0x378] sm:$0xff]  ;;  %v450_v12 = vld [vmem:[%s1659_s16 + $0x768] sm:$0xff]  ;;  %v1133_v15 = vpack.c.bf16 %v447_v9, %v445_v7  ;;  %v449_v21 = vld [vmem:[%s1659_s16 + $0x760] sm:$0xff] }
  0xbf   : > { %1100 = vmatprep.subr.bf16.mxu0 %v1099_v16  ;;  %v1119_v16 = vpack.c.bf16 %v436_v29, %v434_v28  ;;  %616 = vmatprep.mubr.f32.mxu1 %v474_v30  ;;  %v452_v13 = vld [vmem:[%s1659_s16 + $0x778] sm:$0xff]  ;;  %v1007_v17 = vpack.c.bf16 %v324_v11, %v322_v10  ;;  %v451_v23 = vld [vmem:[%s1659_s16 + $0x770] sm:$0xff]  ;;  %v454_v28 = vld [vmem:[%s1659_s16 + $0x788] sm:$0xff] }
  0xc0   : > { %v1135_v22 = vpack.c.bf16 %v452_v13, %v450_v12  ;;  %v328_v25 = vld [vmem:[%s1659_s16 + $0x398] sm:$0xff]  ;;  %v1137_v31 = vpack.c.bf16 %v451_v23, %v449_v21  ;;  %v467_v7 = vld [vmem:[%s1659_s16 + $0x7f0] sm:$0xff] }
  0xc1   : > { %974 = vmatpush1.bf16.msra.mxu1 %v973_v42  ;;  %v993_v42 = vpack.c.bf16 %v307_v36, %v305_v35  ;;  %v456_v29 = vld [vmem:[%s1659_s16 + $0x798] sm:$0xff]  ;;  %v453_v35 = vld [vmem:[%s1659_s16 + $0x780] sm:$0xff] }
  0xc2   : > { %1102 = vmatpush1.bf16.msra.mxu0 %v1101_v43  ;;  %976 = vmatprep.subr.bf16.mxu1 %v975_v44  ;;  %v1121_v43 = vpack.c.bf16 %v435_v38, %v433_v37  ;;  %v995_v44 = vpack.c.bf16 %v312_v40, %v310_v39  ;;  %v1139_v36 = vpack.c.bf16 %v456_v29, %v454_v28  ;;  %v455_v37 = vld [vmem:[%s1659_s16 + $0x790] sm:$0xff]  ;;  %v332_v38 = vld [vmem:[%s1659_s16 + $0x3b8] sm:$0xff]  ;;  %v458_v39 = vld [vmem:[%s1659_s16 + $0x7a8] sm:$0xff] }
  0xc3   : > { %1104 = vmatprep.subr.bf16.mxu0 %v1103_v48  ;;  %v1123_v48 = vpack.c.bf16 %v440_v41, %v438_v20  ;;  %v460_v40 = vld [vmem:[%s1659_s16 + $0x7b8] sm:$0xff]  ;;  %v1141_v41 = vpack.c.bf16 %v455_v37, %v453_v35 }
  0xc5   : > { %978 = vmatpush1.bf16.msra.mxu1 %v977_v54  ;;  %v997_v54 = vpack.c.bf16 %v311_v46, %v309_v45  ;;  %v457_v45 = vld [vmem:[%s1659_s16 + $0x7a0] sm:$0xff]  ;;  %v1143_v46 = vpack.c.bf16 %v460_v40, %v458_v39 }
  0xc6   : > { %1106 = vmatpush1.bf16.msra.mxu0 %v1105_v55  ;;  %980 = vmatprep.subr.bf16.mxu1 %v979_v56  ;;  %v1125_v55 = vpack.c.bf16 %v439_v49, %v437_v47  ;;  %v999_v56 = vpack.c.bf16 %v316_v51, %v314_v50  ;;  %v459_v47 = vld [vmem:[%s1659_s16 + $0x7b0] sm:$0xff]  ;;  %v336_v49 = vld [vmem:[%s1659_s16 + $0x3d8] sm:$0xff]  ;;  %v462_v50 = vld [vmem:[%s1659_s16 + $0x7c8] sm:$0xff] }
  0xc7   : > { %1108 = vmatprep.subr.bf16.mxu0 %v1107_v60  ;;  %v1127_v60 = vpack.c.bf16 %v444_v53, %v442_v52  ;;  %v464_v51 = vld [vmem:[%s1659_s16 + $0x7d8] sm:$0xff]  ;;  %v1145_v53 = vpack.c.bf16 %v459_v47, %v457_v45 }
  0xc9   : > { %982 = vmatpush1.bf16.msra.mxu1 %v981_v2  ;;  %v1001_v2 = vpack.c.bf16 %v315_v58, %v313_v57  ;;  %v461_v57 = vld [vmem:[%s1659_s16 + $0x7c0] sm:$0xff]  ;;  %v1147_v58 = vpack.c.bf16 %v464_v51, %v462_v50 }
  0xca   : > { %1110 = vmatpush1.bf16.msra.mxu0 %v1109_v3  ;;  %984 = vmatprep.subr.bf16.mxu1 %v983_v4  ;;  %v1129_v3 = vpack.c.bf16 %v443_v61, %v441_v59  ;;  %v1003_v4 = vpack.c.bf16 %v320_v63, %v318_v62  ;;  %v463_v59 = vld [vmem:[%s1659_s16 + $0x7d0] sm:$0xff]  ;;  %v340_v61 = vld [vmem:[%s1659_s16 + $0x3f8] sm:$0xff]  ;;  %v466_v62 = vld [vmem:[%s1659_s16 + $0x7e8] sm:$0xff] }
  0xcb   : > { %1112 = vmatprep.subr.bf16.mxu0 %v1111_v8  ;;  %v1131_v8 = vpack.c.bf16 %v448_v1, %v446_v0  ;;  %v468_v63 = vld [vmem:[%s1659_s16 + $0x7f8] sm:$0xff]  ;;  %v1149_v1 = vpack.c.bf16 %v463_v59, %v461_v57 }
  0xcd   : > { %986 = vmatpush1.bf16.msra.mxu1 %v985_v14  ;;  %v1005_v14 = vpack.c.bf16 %v319_v6, %v317_v5  ;;  %v1151_v5 = vpack.c.bf16 %v468_v63, %v466_v62  ;;  %v465_v6 = vld [vmem:[%s1659_s16 + $0x7e0] sm:$0xff] }
  0xce   : > { %1114 = vmatpush1.bf16.msra.mxu0 %v1113_v18  ;;  %988 = vmatprep.subr.bf16.mxu1 %v987_v19  ;;  %v321_v18 = vld [vmem:[%s1659_s16 + $0x360] sm:$0xff]  ;;  %v323_v19 = vld [vmem:[%s1659_s16 + $0x370] sm:$0xff]  ;;  %v1153_v9 = vpack.c.bf16 %v467_v7, %v465_v6 }
  0xcf   : > { %1116 = vmatprep.subr.bf16.mxu0 %v1115_v24  ;;  %v326_v24 = vld [vmem:[%s1659_s16 + $0x388] sm:$0xff]  ;;  %v1009_v30 = vpack.c.bf16 %v323_v19, %v321_v18 }
  0xd1   : > { %990 = vmatpush1.bf16.msra.mxu1 %v989_v32  ;;  %v1011_v32 = vpack.c.bf16 %v328_v25, %v326_v24 }
  0xd2   : > { %1118 = vmatpush1.bf16.msra.mxu0 %v1117_v33  ;;  %992 = vmatprep.subr.bf16.mxu1 %v991_v34  ;;  %v325_v33 = vld [vmem:[%s1659_s16 + $0x380] sm:$0xff]  ;;  %v327_v34 = vld [vmem:[%s1659_s16 + $0x390] sm:$0xff] }
  0xd3   : > { %1120 = vmatprep.subr.bf16.mxu0 %v1119_v16  ;;  %v330_v16 = vld [vmem:[%s1659_s16 + $0x3a8] sm:$0xff]  ;;  %v1013_v20 = vpack.c.bf16 %v327_v34, %v325_v33 }
  0xd5   : > { %994 = vmatpush1.bf16.msra.mxu1 %v993_v42  ;;  %v1015_v42 = vpack.c.bf16 %v332_v38, %v330_v16 }
  0xd6   : > { %1122 = vmatpush1.bf16.msra.mxu0 %v1121_v43  ;;  %996 = vmatprep.subr.bf16.mxu1 %v995_v44  ;;  %v329_v43 = vld [vmem:[%s1659_s16 + $0x3a0] sm:$0xff]  ;;  %v331_v44 = vld [vmem:[%s1659_s16 + $0x3b0] sm:$0xff] }
  0xd7   : > { %1124 = vmatprep.subr.bf16.mxu0 %v1123_v48  ;;  %v334_v48 = vld [vmem:[%s1659_s16 + $0x3c8] sm:$0xff]  ;;  %v1017_v52 = vpack.c.bf16 %v331_v44, %v329_v43 }
  0xd9   : > { %998 = vmatpush1.bf16.msra.mxu1 %v997_v54  ;;  %v1019_v54 = vpack.c.bf16 %v336_v49, %v334_v48 }
  0xda   : > { %1126 = vmatpush1.bf16.msra.mxu0 %v1125_v55  ;;  %1000 = vmatprep.subr.bf16.mxu1 %v999_v56  ;;  %v333_v55 = vld [vmem:[%s1659_s16 + $0x3c0] sm:$0xff]  ;;  %v335_v56 = vld [vmem:[%s1659_s16 + $0x3d0] sm:$0xff] }
  0xdb   : > { %1128 = vmatprep.subr.bf16.mxu0 %v1127_v60  ;;  %v338_v60 = vld [vmem:[%s1659_s16 + $0x3e8] sm:$0xff]  ;;  %v1021_v0 = vpack.c.bf16 %v335_v56, %v333_v55 }
  0xdd   : > { %1002 = vmatpush1.bf16.msra.mxu1 %v1001_v2  ;;  %v1023_v2 = vpack.c.bf16 %v340_v61, %v338_v60 }
  0xde   : > { %1130 = vmatpush1.bf16.msra.mxu0 %v1129_v3  ;;  %1004 = vmatprep.subr.bf16.mxu1 %v1003_v4  ;;  %v337_v3 = vld [vmem:[%s1659_s16 + $0x3e0] sm:$0xff]  ;;  %v339_v4 = vld [vmem:[%s1659_s16 + $0x3f0] sm:$0xff] }
  0xdf   : > { %1132 = vmatprep.subr.bf16.mxu0 %v1131_v8  ;;  %v1025_v8 = vpack.c.bf16 %v339_v4, %v337_v3 }
  0xe1   : > { %1006 = vmatpush1.bf16.msra.mxu1 %v1005_v14 }
  0xe2   : > { %1134 = vmatpush1.bf16.msra.mxu0 %v1133_v15  ;;  %1008 = vmatprep.subr.bf16.mxu1 %v1007_v17 }
  0xe3   : > { %1136 = vmatprep.subr.bf16.mxu0 %v1135_v22 }
  0xe5   : > { %1010 = vmatpush1.bf16.msra.mxu1 %v1009_v30 }
  0xe6   : > { %1138 = vmatpush1.bf16.msra.mxu0 %v1137_v31  ;;  %1012 = vmatprep.subr.bf16.mxu1 %v1011_v32 }
  0xe7   : > { %1140 = vmatprep.subr.bf16.mxu0 %v1139_v36 }
  0xe9   : > { %1014 = vmatpush1.bf16.msra.mxu1 %v1013_v20 }
  0xea   : > { %1142 = vmatpush1.bf16.msra.mxu0 %v1141_v41  ;;  %1016 = vmatprep.subr.bf16.mxu1 %v1015_v42 }
  0xeb   : > { %1144 = vmatprep.subr.bf16.mxu0 %v1143_v46 }
  0xed   : > { %1018 = vmatpush1.bf16.msra.mxu1 %v1017_v52 }
  0xee   : > { %1146 = vmatpush1.bf16.msra.mxu0 %v1145_v53  ;;  %1020 = vmatprep.subr.bf16.mxu1 %v1019_v54 }
  0xef   : > { %1148 = vmatprep.subr.bf16.mxu0 %v1147_v58 }
  0xf1   : > { %1022 = vmatpush1.bf16.msra.mxu1 %v1021_v0 }
  0xf2   : > { %1150 = vmatpush1.bf16.msra.mxu0 %v1149_v1  ;;  %1024 = vmatprep.subr.bf16.mxu1 %v1023_v2 }
  0xf3   : > { %1152 = vmatprep.subr.bf16.mxu0 %v1151_v5 }
  0xf5   : > { %1026 = vmatpush1.bf16.msra.mxu1 %v1025_v8 }
  0xf6   : > { %1154 = vmatpush1.bf16.msra.mxu0 %v1153_v9 }
  0xf8   : > { %617 = vmatmul.mubr.f32.vlgmr.msra.gmra.mrb[0].mxu1 %v1864_v26 }
  0xf9   : > { %759 = vmatmul.mubr.f32.vlgmr.msra.gmra.mrb[0].mxu0 %v1867_v27 }
 0x1cb   : > { %v618_v10 = vpop.f32.mrb[0].mxu1 }
 0x1cc   : > { %v760_v11 = vpop.f32.mrb[0].mxu0  ;;  %v620_v12 = vpop.f32.mrb[1].mxu1 }
 0x1cd   : > { %v1155_v13 = vadd.f32 %v760_v11, %v618_v10  ;;  %v762_v14 = vpop.f32.mrb[1].mxu0 }
 0x1ce   : > { %v1156_v15 = vadd.f32 %v762_v14, %v620_v12 }
 0x1d0   : > { %v767_v17 = vcombine.low %v1155_v13, %v1156_v15 }
 0x1d2   : > { %769 = vst [vmem:[%s207_s19] sm:$0xff] %v767_v17 }
 0x1d3   : > { %1330 = shalt.err (!%p1327_p0)
}
 0x1d4   : > { %s1331_s9 = scalar_lea.hbm %s1950_s20, 128  ;;  %s1335_s13 = scalar_lea.hbm %s2005_s3, 768 }
 0x1d5   : > { %p1332_p4 = scmp.ne.s32.totalorder %s1950_s20, %s1331_s9  ;;  %p1336_p1 = scmp.lt.u32.totalorder %s1950_s20, %s2005_s3 }
 0x1d6   : > { %p1337_p7 = scmp.lt.u32.totalorder %s1335_s13, %s1331_s9  ;;  %p1339_p11 = scmp.lt.u32.totalorder %s1331_s9, %s1950_s20 }
 0x1d7   : > { %p1333_p9 = pnand %p1332_p4, %p2025_p12 }
 0x1d8   : > { %p1338_p8 = por %p1337_p7, %p1336_p1 }
 0x1d9   : > { %p1334_p10 = pneg %p1333_p9 }
 0x1da   : > { %p1340_p13 = por %p1339_p11, %p1338_p8 }
 0x1dc   : > { %p1341_p6 = pnand %p1340_p13, %p1334_p10 }
 0x1de   : > { %1344 = shalt.err (!%p1341_p6)
}
 0x1df   : > { %1167 = dma.vmem_to_hbm [thread:$0]  (%p2025_p12), %s1952_s8, 128, %s1950_s20, %s771_s30  }
 0x1e0 PF: > { %p1183_p5 = scmp.ge.s32.totalorder %s1413_s27, 2  ;;  %s797_s12 = sand.u32 1, %s1389_s22  }
 0x1e1   : > { %p2026_p3 = scmp.ne.s32.totalorder %s2020_s21, 0  ;;  %s798_s19 = scalar_lea.sflag [#allocation6], %s797_s12 }
 0x1e3   : > { %p1179_p2 = pnand %p1183_p5, %p2026_p3 }
 0x1e5   : > { %1384 = dma.done.wait (!%p1179_p2), %s798_s19, 128  }
 0x1e6   : > { %1386 = vsyncadd (!%p1179_p2), %s798_s19, 4294967168  ;;  %p23_p12 = scmp.ge.s32.totalorder %s1490_s29, 8   ;;  %s2027_s22 = smov %s1393_s23 }
 0x1e7   : > { %s2028_s23 = smov %s1397_s24  ;;  %s2029_s24 = smov %s1576_s10 }
 0x1e8   : > { %s2030_s25 = smov %s1405_s26  ;;  %s2031_s26 = smov %s1409_s0 }
 0x1e9   : > { %s2032_s0 = smov %s1518_s11  ;;  %s2033_s27 = smov %s1490_s29 }
 0x1ea   :  { %25 = sbr.rel (!%p23_p12) target bundleno = 21 (0x15), region = 86 }
 0x1f1   :  { %803 = vsyncpa [#allocation5], 1 }
 0x1f2   :  { %805 = vsyncpa [#allocation5 + $0x1], 1 }
 0x1f3   :  { %806 = vsyncpa [#allocation8], 1 }
 0x1f4   :  { %808 = vsyncpa [#allocation8 + $0x1], 1 }
 0x1f5   :  { %809 = vsyncpa [#allocation6], 1 }
 0x1f6   :  { %811 = vsyncpa [#allocation6 + $0x1], 1 }

</bundles_post_ra>
